<compile_context>
chip_gen: v5e
topology: v5e:2x2
jax: 0.10.0
libtpu: 0.0.40
codegen_flags: <defaults>
</compile_context>

<pallas_src>
import jax
import jax.numpy as jnp
from jax.experimental import pallas as pl
from jax.experimental.pallas import tpu as pltpu

# ----------------------------- configuration -----------------------------
B = 2            # batch for the small sanity run
C, HW = 3, 16    # image channels / spatial  (imgs: (B, 3, 16, 16))
EMBED = 64       # clip_model.visual.output_dim (small synthetic value)
HID = 512        # hidden width of the head
OUT = 2          # regression outputs

_INV_SQRT2 = 0.7071067811865476


# ------------------------------ Pallas kernel -----------------------------
def fused_kernel(imgs_ref, w_enc_ref, ln_w_ref, ln_b_ref,
                 w1_ref, b1_ref, w2_ref, b2_ref, o_ref):
    """Frozen-encoder projection + LayerNorm -> Linear -> GELU -> Linear -> Tanh.

    imgs_ref : (TB, C*H*W) bf16      (analog of imgs.half())
    w_enc    : (C*H*W, EMBED) bf16   (frozen synthetic encoder)
    head params: LN f32, W1 bf16, b1 f32, W2 f32, b2 f32
    o_ref    : (TB, OUT) f32
    """
    # --- synthetic frozen CLIP projection: bf16 MXU inputs, f32 accumulation
    feats = jnp.dot(imgs_ref[...], w_enc_ref[...],
                    preferred_element_type=jnp.float32)        # (TB, EMBED) f32

    # --- LayerNorm over last dim (eps = 1e-6, affine), all f32 on the VPU
    mean = jnp.mean(feats, axis=-1, keepdims=True)
    xc = feats - mean
    var = jnp.mean(xc * xc, axis=-1, keepdims=True)
    xn = xc * jax.lax.rsqrt(var + 1e-6)
    xn = xn * ln_w_ref[...] + ln_b_ref[...]                    # broadcast (1, EMBED)

    # --- Linear(EMBED -> HID): bf16 MXU inputs, f32 accumulation
    h = jnp.dot(xn.astype(jnp.bfloat16), w1_ref[...],
                preferred_element_type=jnp.float32)
    h = h + b1_ref[...]

    # --- GELU (exact / erf form, matching torch.nn.GELU default), f32
    h = 0.5 * h * (1.0 + jax.lax.erf(h * _INV_SQRT2))

    # --- Linear(HID -> OUT), f32 (W2 is tiny; keep full precision)
    y = jnp.dot(h, w2_ref[...], preferred_element_type=jnp.float32)
    y = y + b2_ref[...]

    # --- Tanh
    o_ref[...] = jnp.tanh(y)


# --------------------------------- wrapper ---------------------------------
def clip_regressor_forward(imgs, params, *, batch_tile=None):
    """imgs: (B, C, H, W) float32 NCHW -> (B, OUT) float32."""
    b = imgs.shape[0]
    in_flat = 1
    for d in imgs.shape[1:]:
        in_flat *= d
    flat = imgs.reshape(b, in_flat).astype(jnp.bfloat16)   # analog of .half()

    args = (flat, params["w_enc"], params["ln_w"], params["ln_b"],
            params["w1"], params["b1"], params["w2"], params["b2"])
    out_shape = jax.ShapeDtypeStruct((b, OUT), jnp.float32)

    if batch_tile is None or batch_tile >= b:
        # Small-batch path: everything resident in VMEM, grid=() -> no
        # software-pipeline machinery (no double buffers / DMA bookkeeping).
        vmem = pl.BlockSpec(memory_space=pltpu.MemorySpace.VMEM)
        return pl.pallas_call(
            fused_kernel,
            out_shape=out_shape,
            in_specs=[vmem] * len(args),
            out_specs=vmem,
        )(*args)

    # Batch-tiled path for realistic batches: tile B, weights stay resident.
    assert b % batch_tile == 0, "batch must be a multiple of batch_tile"
    tb = batch_tile

    def full(shape):
        return pl.BlockSpec(shape, lambda i: (0,) * len(shape))

    return pl.pallas_call(
        fused_kernel,
        out_shape=out_shape,
        grid=(b // tb,),
        in_specs=[
            pl.BlockSpec((tb, in_flat), lambda i: (i, 0)),      # imgs (tiled)
            full(params["w_enc"].shape),
            full(params["ln_w"].shape),
            full(params["ln_b"].shape),
            full(params["w1"].shape),
            full(params["b1"].shape),
            full(params["w2"].shape),
            full(params["b2"].shape),
        ],
        out_specs=pl.BlockSpec((tb, OUT), lambda i: (i, 0)),
        compiler_params=pltpu.CompilerParams(
            dimension_semantics=("parallel",)),                 # megacore / v7x 2 TCs
    )(*args)


# ------------------------------- param init --------------------------------
def init_params(key):
    k_enc, k1, k2, kb1, kb2 = jax.random.split(key, 5)
    in_flat = C * HW * HW
    return {
        # synthetic frozen encoder projection, stored bf16 (TPU-native MXU dtype)
        "w_enc": (jax.random.normal(k_enc, (in_flat, EMBED), jnp.float32)
                  * (1.0 / jnp.sqrt(in_flat))).astype(jnp.bfloat16),
        # LayerNorm: PyTorch default init (weight=1, bias=0), kept 2D for VMEM
        "ln_w": jnp.ones((1, EMBED), jnp.float32),
        "ln_b": jnp.zeros((1, EMBED), jnp.float32),
        # Linear(EMBED, 512): weights bf16 for the MXU, biases f32
        "w1": (jax.random.normal(k1, (EMBED, HID), jnp.float32)
               * (1.0 / jnp.sqrt(EMBED))).astype(jnp.bfloat16),
        "b1": jax.random.normal(kb1, (1, HID), jnp.float32) * 0.01,
        # Linear(512, 2): tiny, kept f32
        "w2": jax.random.normal(k2, (HID, OUT), jnp.float32)
              * (1.0 / jnp.sqrt(HID)),
        "b2": jax.random.normal(kb2, (1, OUT), jnp.float32) * 0.01,
    }


# ----------------------------- pure-JAX reference ---------------------------
def reference_forward(imgs, params):
    b = imgs.shape[0]
    flat = imgs.reshape(b, -1).astype(jnp.bfloat16)
    feats = jnp.dot(flat, params["w_enc"], preferred_element_type=jnp.float32)
    mean = jnp.mean(feats, axis=-1, keepdims=True)
    xc = feats - mean
    var = jnp.mean(xc * xc, axis=-1, keepdims=True)
    xn = xc * jax.lax.rsqrt(var + 1e-6)
    xn = xn * params["ln_w"] + params["ln_b"]
    h = jnp.dot(xn.astype(jnp.bfloat16), params["w1"],
                preferred_element_type=jnp.float32) + params["b1"]
    h = 0.5 * h * (1.0 + jax.lax.erf(h * _INV_SQRT2))
    y = jnp.dot(h, params["w2"], preferred_element_type=jnp.float32) + params["b2"]
    return jnp.tanh(y)


# ----------------------------------- main -----------------------------------
if __name__ == "__main__":
    key = jax.random.PRNGKey(0)
    k_img, k_par, k_big = jax.random.split(key, 3)

    params = init_params(k_par)

    # --- small-batch path (no grid, fully VMEM-resident) ---
    imgs = jax.random.normal(k_img, (B, C, HW, HW), jnp.float32)   # NCHW
    out = jax.block_until_ready(clip_regressor_forward(imgs, params))
    ref = reference_forward(imgs, params)
    assert out.shape == (B, OUT) and out.dtype == jnp.float32
    assert jnp.allclose(out, ref, atol=1e-4, rtol=1e-4)

    # --- batch-tiled path (grid over batch, "parallel" axis) ---
    BIG_B, TB = 256, 128
    imgs_big = jax.random.normal(k_big, (BIG_B, C, HW, HW), jnp.float32)
    out_big = jax.block_until_ready(
        clip_regressor_forward(imgs_big, params, batch_tile=TB))
    ref_big = reference_forward(imgs_big, params)
    assert out_big.shape == (BIG_B, OUT) and out_big.dtype == jnp.float32
    assert jnp.allclose(out_big, ref_big, atol=1e-4, rtol=1e-4)

    print("KERNEL_OK")
</pallas_src>

<mosaic_0001>
module attributes {stable_mosaic.version = 11 : i64} {
  func.func @fused_kernel(%arg0: memref<2x768xbf16, #tpu.memory_space<vmem>>, %arg1: memref<768x64xbf16, #tpu.memory_space<vmem>>, %arg2: memref<1x64xf32, #tpu.memory_space<vmem>>, %arg3: memref<1x64xf32, #tpu.memory_space<vmem>>, %arg4: memref<64x512xbf16, #tpu.memory_space<vmem>>, %arg5: memref<1x512xf32, #tpu.memory_space<vmem>>, %arg6: memref<512x2xf32, #tpu.memory_space<vmem>>, %arg7: memref<1x2xf32, #tpu.memory_space<vmem>>, %arg8: memref<2x2xf32, #tpu.memory_space<vmem>>) attributes {dimension_semantics = [], scalar_prefetch = 0 : i64, scratch_operands = 0 : i64, tpu.core_type = #tpu.core_type<tc>} {
    %c0 = arith.constant 0 : index
    %c0_0 = arith.constant 0 : index
    %0 = vector.load %arg0[%c0, %c0_0] : memref<2x768xbf16, #tpu.memory_space<vmem>>, vector<2x768xbf16>
    %c0_1 = arith.constant 0 : index
    %c0_2 = arith.constant 0 : index
    %1 = vector.load %arg1[%c0_1, %c0_2] : memref<768x64xbf16, #tpu.memory_space<vmem>>, vector<768x64xbf16>
    %cst = arith.constant dense<0.000000e+00> : vector<2x64xf32>
    %2 = tpu.matmul %0, %1, %cst {dimension_numbers = #tpu.dot_dimension_numbers<[1], [0], [0], [1], [0, 0, 1, 1], [], []>} : vector<2x768xbf16>, vector<768x64xbf16>, vector<2x64xf32> -> vector<2x64xf32>
    %cst_3 = arith.constant dense<0.000000e+00> : vector<2xf32>
    %3 = vector.multi_reduction <add>, %2, %cst_3 [1] : vector<2x64xf32> to vector<2xf32>
    %4 = vector.shape_cast %3 : vector<2xf32> to vector<2x1xf32>
    %cst_4 = arith.constant 6.400000e+01 : f32
    %5 = vector.broadcast %cst_4 : f32 to vector<2x1xf32>
    %6 = arith.divf %4, %5 : vector<2x1xf32>
    %7 = vector.broadcast %6 : vector<2x1xf32> to vector<2x64xf32>
    %8 = arith.subf %2, %7 : vector<2x64xf32>
    %9 = arith.mulf %8, %8 : vector<2x64xf32>
    %cst_5 = arith.constant dense<0.000000e+00> : vector<2xf32>
    %10 = vector.multi_reduction <add>, %9, %cst_5 [1] : vector<2x64xf32> to vector<2xf32>
    %11 = vector.shape_cast %10 : vector<2xf32> to vector<2x1xf32>
    %cst_6 = arith.constant 6.400000e+01 : f32
    %12 = vector.broadcast %cst_6 : f32 to vector<2x1xf32>
    %13 = arith.divf %11, %12 : vector<2x1xf32>
    %cst_7 = arith.constant 9.99999997E-7 : f32
    %14 = vector.broadcast %cst_7 : f32 to vector<2x1xf32>
    %15 = arith.addf %13, %14 : vector<2x1xf32>
    %16 = math.rsqrt %15 : vector<2x1xf32>
    %17 = vector.broadcast %16 : vector<2x1xf32> to vector<2x64xf32>
    %18 = arith.mulf %8, %17 : vector<2x64xf32>
    %c0_8 = arith.constant 0 : index
    %c0_9 = arith.constant 0 : index
    %19 = vector.load %arg2[%c0_8, %c0_9] : memref<1x64xf32, #tpu.memory_space<vmem>>, vector<1x64xf32>
    %20 = vector.broadcast %19 : vector<1x64xf32> to vector<2x64xf32>
    %21 = arith.mulf %18, %20 : vector<2x64xf32>
    %c0_10 = arith.constant 0 : index
    %c0_11 = arith.constant 0 : index
    %22 = vector.load %arg3[%c0_10, %c0_11] : memref<1x64xf32, #tpu.memory_space<vmem>>, vector<1x64xf32>
    %23 = vector.broadcast %22 : vector<1x64xf32> to vector<2x64xf32>
    %24 = arith.addf %21, %23 : vector<2x64xf32>
    %25 = arith.truncf %24 : vector<2x64xf32> to vector<2x64xbf16>
    %c0_12 = arith.constant 0 : index
    %c0_13 = arith.constant 0 : index
    %26 = vector.load %arg4[%c0_12, %c0_13] : memref<64x512xbf16, #tpu.memory_space<vmem>>, vector<64x512xbf16>
    %cst_14 = arith.constant dense<0.000000e+00> : vector<2x512xf32>
    %27 = tpu.matmul %25, %26, %cst_14 {dimension_numbers = #tpu.dot_dimension_numbers<[1], [0], [0], [1], [0, 0, 1, 1], [], []>} : vector<2x64xbf16>, vector<64x512xbf16>, vector<2x512xf32> -> vector<2x512xf32>
    %c0_15 = arith.constant 0 : index
    %c0_16 = arith.constant 0 : index
    %28 = vector.load %arg5[%c0_15, %c0_16] : memref<1x512xf32, #tpu.memory_space<vmem>>, vector<1x512xf32>
    %29 = vector.broadcast %28 : vector<1x512xf32> to vector<2x512xf32>
    %30 = arith.addf %27, %29 : vector<2x512xf32>
    %cst_17 = arith.constant 5.000000e-01 : f32
    %31 = vector.broadcast %cst_17 : f32 to vector<2x512xf32>
    %32 = arith.mulf %31, %30 : vector<2x512xf32>
    %cst_18 = arith.constant 0.707106769 : f32
    %33 = vector.broadcast %cst_18 : f32 to vector<2x512xf32>
    %34 = arith.mulf %30, %33 : vector<2x512xf32>
    %35 = math.erf %34 : vector<2x512xf32>
    %cst_19 = arith.constant 1.000000e+00 : f32
    %36 = vector.broadcast %cst_19 : f32 to vector<2x512xf32>
    %37 = arith.addf %36, %35 : vector<2x512xf32>
    %38 = arith.mulf %32, %37 : vector<2x512xf32>
    %c0_20 = arith.constant 0 : index
    %c0_21 = arith.constant 0 : index
    %39 = vector.load %arg6[%c0_20, %c0_21] : memref<512x2xf32, #tpu.memory_space<vmem>>, vector<512x2xf32>
    %cst_22 = arith.constant dense<0.000000e+00> : vector<2x2xf32>
    %40 = tpu.matmul %38, %39, %cst_22 {dimension_numbers = #tpu.dot_dimension_numbers<[1], [0], [0], [1], [0, 0, 1, 1], [], []>} : vector<2x512xf32>, vector<512x2xf32>, vector<2x2xf32> -> vector<2x2xf32>
    %c0_23 = arith.constant 0 : index
    %c0_24 = arith.constant 0 : index
    %41 = vector.load %arg7[%c0_23, %c0_24] : memref<1x2xf32, #tpu.memory_space<vmem>>, vector<1x2xf32>
    %42 = vector.broadcast %41 : vector<1x2xf32> to vector<2x2xf32>
    %43 = arith.addf %40, %42 : vector<2x2xf32>
    %44 = math.tanh %43 : vector<2x2xf32>
    %c0_25 = arith.constant 0 : index
    %c0_26 = arith.constant 0 : index
    %45 = vector.load %arg8[%c0_25, %c0_26] : memref<2x2xf32, #tpu.memory_space<vmem>>, vector<2x2xf32>
    tpu.vector_store %arg8[%c0_25, %c0_26], %44 {strides = array<i32>} : memref<2x2xf32, #tpu.memory_space<vmem>>, vector<2x2xf32>,
    return
  }
}

</mosaic_0001>

<bundles_post_ra>
// kernel: tpu_custom_call.1
= control target key start
LH: loop header
LB: loop body
LE: loop exit
PB: predicated region body
PF: predicated region fallthrough
CT: control target
= control target key end

     0   :  { %s2055_s0 = inlined_call_operand.vmem [shape: bf16[2,768], index: 0, kind: input, shape index: {}]   ;;  %s2056_s1 = inlined_call_operand.vmem [shape: bf16[768,64], index: 1, kind: input, shape index: {}]   ;;  %s2057_s2 = inlined_call_operand.vmem [shape: f32[1,64], index: 2, kind: input, shape index: {}]   ;;  %s2058_s3 = inlined_call_operand.vmem [shape: f32[1,64], index: 3, kind: input, shape index: {}]   ;;  %s2059_s4 = inlined_call_operand.vmem [shape: bf16[64,512], index: 4, kind: input, shape index: {}]   ;;  %s2060_s5 = inlined_call_operand.vmem [shape: f32[1,512], index: 5, kind: input, shape index: {}]   ;;  %s2061_s6 = inlined_call_operand.vmem [shape: f32[512,2], index: 6, kind: input, shape index: {}]   ;;  %s2062_s7 = inlined_call_operand.vmem [shape: f32[1,2], index: 7, kind: input, shape index: {}]   ;;  %s2063_s8 = inlined_call_operand.hbm [shape: f32[2,2], index: 8, kind: output, shape index: {}]  }
   0x1   :  { %v1325_v0 = vld [vmem:[%s2056_s1 + $0x38] sm:$0xff]  ;;  %v1324_v2 = vld [vmem:[%s2056_s1 + $0x30] sm:$0xff]  ;;  %v1323_v8 = vld [vmem:[%s2056_s1 + $0x28] sm:$0xff] }
   0x2   :  { %v1333_v1 = vld [vmem:[%s2056_s1 + $0x78] sm:$0xff]  ;;  %430 = vmatpush.bf16.msra.mxu0 %v1325_v0  ;;  %v1332_v3 = vld [vmem:[%s2056_s1 + $0x70] sm:$0xff]  ;;  %v1331_v9 = vld [vmem:[%s2056_s1 + $0x68] sm:$0xff] }
   0x3   :  { %443 = vmatpush.bf16.msra.mxu1 %v1333_v1  ;;  %v1341_v4 = vld [vmem:[%s2056_s1 + $0xb8] sm:$0xff]  ;;  %v1340_v6 = vld [vmem:[%s2056_s1 + $0xb0] sm:$0xff]  ;;  %v1339_v10 = vld [vmem:[%s2056_s1 + $0xa8] sm:$0xff] }
   0x4   :  { %v1349_v5 = vld [vmem:[%s2056_s1 + $0xf8] sm:$0xff]  ;;  %456 = vmatpush.bf16.msra.mxu2 %v1341_v4  ;;  %v1348_v7 = vld [vmem:[%s2056_s1 + $0xf0] sm:$0xff]  ;;  %v1347_v11 = vld [vmem:[%s2056_s1 + $0xe8] sm:$0xff] }
   0x5   :  { %469 = vmatpush.bf16.msra.mxu3 %v1349_v5  ;;  %v1322_v12 = vld [vmem:[%s2056_s1 + $0x20] sm:$0xff]  ;;  %v1321_v17 = vld [vmem:[%s2056_s1 + $0x18] sm:$0xff] }
   0x6   :  { %431 = vmatpush.bf16.msra.mxu0 %v1324_v2  ;;  %v1330_v13 = vld [vmem:[%s2056_s1 + $0x60] sm:$0xff]  ;;  %v1329_v18 = vld [vmem:[%s2056_s1 + $0x58] sm:$0xff] }
   0x7   :  { %444 = vmatpush.bf16.msra.mxu1 %v1332_v3  ;;  %v31_v14 = vld [vmem:[%s2055_s0] sm:$0x3f] }
   0x8   :  { %457 = vmatpush.bf16.msra.mxu2 %v1340_v6  ;;  %v1338_v15 = vld [vmem:[%s2056_s1 + $0xa0] sm:$0xff]  ;;  %129 = vst [vmem:[#allocation1] ss:$9 sm:$0xff] %v31_v14 }
   0x9   :  { %470 = vmatpush.bf16.msra.mxu3 %v1348_v7  ;;  %v1346_v16 = vld [vmem:[%s2056_s1 + $0xe0] sm:$0xff] }
   0xa   :  { %432 = vmatpush.bf16.msra.mxu0 %v1323_v8 }
   0xb   :  { %445 = vmatpush.bf16.msra.mxu1 %v1331_v9 }
   0xc   :  { %458 = vmatpush.bf16.msra.mxu2 %v1339_v10 }
   0xd   :  { %471 = vmatpush.bf16.msra.mxu3 %v1347_v11 }
   0xe   :  { %433 = vmatpush.bf16.msra.mxu0 %v1322_v12 }
   0xf   :  { %446 = vmatpush.bf16.msra.mxu1 %v1330_v13 }
  0x10   :  { %13 = vsyncpa [#allocation3], 0  ;;  %459 = vmatpush.bf16.msra.mxu2 %v1338_v15  ;;  %v1337_v19 = vld [vmem:[%s2056_s1 + $0x98] sm:$0xff]  ;;  %v1320_v21 = vld [vmem:[%s2056_s1 + $0x10] sm:$0xff]  ;;  %vm508_vm0 = vcmask 517120   ;;  %v1427_v9 = vmov 64.0  }
  0x11   :  { %472 = vmatpush.bf16.msra.mxu3 %v1346_v16  ;;  %v1345_v20 = vld [vmem:[%s2056_s1 + $0xd8] sm:$0xff]  ;;  %v1328_v22 = vld [vmem:[%s2056_s1 + $0x50] sm:$0xff]  ;;  %v1319_v25 = vld [vmem:[%s2056_s1 + $0x8] sm:$0xff]  ;;  %1387 = vrcp.f32 %v1427_v9  ;;  %vm655_vm5 = vcmask 523264   ;;  %s1428_s21 = smov [#allocation2]   ;;  %s1045_s25 = sshll.u32 %s2063_s8, 4  ;;  %s1046_s25 = int_to_ptr.hbm [resolvable:$true] %s1045_s25 }
  0x12   :  { %434 = vmatpush.bf16.msra.mxu0 %v1321_v17  ;;  %v1336_v23 = vld [vmem:[%s2056_s1 + $0x90] sm:$0xff]  ;;  %v1327_v26 = vld [vmem:[%s2056_s1 + $0x48] sm:$0xff]  ;;  %v1318_v29 = vld [vmem:[%s2056_s1] sm:$0xff]  ;;  %s1043_s22 = sshll.u32 %s1428_s21, 4  ;;  %s1044_s22 = int_to_ptr.vmem [resolvable:$true] %s1043_s22 }
  0x13   :  { %447 = vmatpush.bf16.msra.mxu1 %v1329_v18  ;;  %v1344_v24 = vld [vmem:[%s2056_s1 + $0xd0] sm:$0xff]  ;;  %v1335_v27 = vld [vmem:[%s2056_s1 + $0x88] sm:$0xff]  ;;  %v1326_v30 = vld [vmem:[%s2056_s1 + $0x40] sm:$0xff] }
  0x14   :  { %460 = vmatpush.bf16.msra.mxu2 %v1337_v19  ;;  %v1343_v28 = vld [vmem:[%s2056_s1 + $0xc8] sm:$0xff]  ;;  %v1357_v31 = vld [vmem:[%s2056_s1 + $0x138] sm:$0xff]  ;;  %v1334_v33 = vld [vmem:[%s2056_s1 + $0x80] sm:$0xff] }
  0x15   :  { %473 = vmatpush.bf16.msra.mxu3 %v1345_v20  ;;  %v1365_v32 = vld [vmem:[%s2056_s1 + $0x178] sm:$0xff]  ;;  %v1342_v34 = vld [vmem:[%s2056_s1 + $0xc0] sm:$0xff]  ;;  %v131_v36 = vld [vmem:[#allocation1 + $0x9] sm:$0xff] }
  0x16   :  { %435 = vmatpush.bf16.msra.mxu0 %v1320_v21  ;;  %v130_v35 = vld [vmem:[#allocation1] sm:$0xff]  ;;  %v1356_v37 = vld [vmem:[%s2056_s1 + $0x130] sm:$0xff]  ;;  %v1355_v41 = vld [vmem:[%s2056_s1 + $0x128] sm:$0xff] }
  0x17   :  { %448 = vmatpush.bf16.msra.mxu1 %v1328_v22  ;;  %v1364_v38 = vld [vmem:[%s2056_s1 + $0x170] sm:$0xff]  ;;  %v133_v40 = vld [vmem:[#allocation1 + $0x1b] sm:$0xff]  ;;  %v1363_v42 = vld [vmem:[%s2056_s1 + $0x168] sm:$0xff]  ;;  %v1388_v10 = vpop.eup %1387 }
  0x18   :  { %461 = vmatpush.bf16.msra.mxu2 %v1336_v23  ;;  %v132_v39 = vld [vmem:[#allocation1 + $0x12] sm:$0xff]  ;;  %v1354_v43 = vld [vmem:[%s2056_s1 + $0x120] sm:$0xff]  ;;  %v1351_v49 = vld [vmem:[%s2056_s1 + $0x108] sm:$0xff]  ;;  %v513_v11 = vmul.f32 64.0, %v1388_v10  ;;  %vm517_vm1 = vweird.f32 %v1388_v10 }
  0x19   :  { %474 = vmatpush.bf16.msra.mxu3 %v1344_v24  ;;  %v1362_v44 = vld [vmem:[%s2056_s1 + $0x160] sm:$0xff]  ;;  %v1353_v45 = vld [vmem:[%s2056_s1 + $0x118] sm:$0xff]  ;;  %v1352_v47 = vld [vmem:[%s2056_s1 + $0x110] sm:$0xff] }
  0x1a   :  { %436 = vmatpush.bf16.msra.mxu0 %v1319_v25  ;;  %v1361_v46 = vld [vmem:[%s2056_s1 + $0x158] sm:$0xff]  ;;  %v1360_v48 = vld [vmem:[%s2056_s1 + $0x150] sm:$0xff]  ;;  %v1359_v50 = vld [vmem:[%s2056_s1 + $0x148] sm:$0xff]  ;;  %v514_v12 = vsub.f32 1.0, %v513_v11 }
  0x1b   :  { %449 = vmatpush.bf16.msra.mxu1 %v1327_v26  ;;  %v1350_v51 = vld [vmem:[%s2056_s1 + $0x100] sm:$0xff]  ;;  %v135_v54 = vld [vmem:[#allocation1 + $0x2d] sm:$0xff] }
  0x1c   :  { %462 = vmatpush.bf16.msra.mxu2 %v1335_v27  ;;  %v1358_v52 = vld [vmem:[%s2056_s1 + $0x140] sm:$0xff]  ;;  %v515_v13 = vmul.f32 %v1388_v10, %v514_v12  ;;  %v1380_v22 = vld [vmem:[%s2059_s4 + $0x6c] sm:$0xf0]  ;;  %v1298_v25 = vld [vmem:[%s2059_s4 + $0x70] sm:$0xf0] }
  0x1d   :  { %475 = vmatpush.bf16.msra.mxu3 %v1343_v28  ;;  %v134_v53 = vld [vmem:[#allocation1 + $0x24] sm:$0xff]  ;;  %v1296_v21 = vld [vmem:[%s2059_s4 + $0x60] sm:$0xf]  ;;  %v1376_v28 = vld [vmem:[%s2059_s4 + $0x4c] sm:$0xf0] }
  0x1e   :  { %437 = vmatpush.bf16.msra.mxu0 %v1318_v29  ;;  %v516_v14 = vadd.f32 %v1388_v10, %v515_v13  ;;  %v1378_v23 = vld [vmem:[%s2059_s4 + $0x64] sm:$0xf]  ;;  %v1297_v24 = vor.u32 %v1380_v22, %v1296_v21  ;;  %v1280_v27 = vld [vmem:[%s2059_s4 + $0x40] sm:$0xf] }
  0x1f   :  { %450 = vmatpush.bf16.msra.mxu1 %v1326_v30  ;;  %v1301_v26 = vor.u32 %v1378_v23, %v1298_v25  ;;  %v1374_v29 = vld [vmem:[%s2059_s4 + $0x44] sm:$0xf]  ;;  %v1281_v30 = vor.u32 %v1376_v28, %v1280_v27  ;;  %v1733_v22 = vld [vmem:[%s2060_s5] sm:$0xf]  ;;  %v918_v25 = vld [vmem:[%s2061_s6 + $0xf8] sm:$0xff] }
  0x20   :  { %463 = vmatpush.bf16.msra.mxu2 %v1334_v33  ;;  %v518_v15 = vsel %vm517_vm1, %v1388_v10, %v516_v14  ;;  %v1264_v33 = vld [vmem:[%s2059_s4 + $0x20] sm:$0xf]  ;;  %v567_v23 = vperm.slane %v1733_v22, 0 }
  0x21   :  { %476 = vmatpush.bf16.msra.mxu3 %v1342_v34  ;;  %438 = vmatmul.bf16.vlgmr.msra.gmra.mxu0 %v130_v35  ;;  %v1372_v34 = vld [vmem:[%s2059_s4 + $0x2c] sm:$0xf0]  ;;  %v1370_v35 = vld [vmem:[%s2059_s4 + $0x24] sm:$0xf]  ;;  %v1384_v14 = vld [vmem:[%s2057_s2] ss:$0 sm:$0xff] }
  0x22   :  { %482 = vmatpush.bf16.msrb.mxu0 %v1357_v31  ;;  %451 = vmatmul.bf16.vlgmr.msra.gmra.mxu1 %v131_v36  ;;  %v1282_v31 = vld [vmem:[%s2059_s4 + $0x50] sm:$0xf0]  ;;  %v1265_v36 = vor.u32 %v1372_v34, %v1264_v33  ;;  %v900_v34 = vld [vmem:[%s2061_s6 + $0x68] sm:$0xff] }
  0x23   :  { %495 = vmatpush.bf16.msrb.mxu1 %v1365_v32  ;;  %464 = vmatmul.bf16.vlgmr.msra.gmra.mxu2 %v132_v39  ;;  %v1285_v32 = vor.u32 %v1374_v29, %v1282_v31  ;;  %v1248_v39 = vld [vmem:[%s2059_s4] sm:$0xf]  ;;  %v917_v31 = vld [vmem:[%s2061_s6 + $0xf0] sm:$0xff] }
  0x24   :  { %477 = vmatmul.bf16.vlgmr.msra.gmra.mxu3 %v133_v40  ;;  %663 = vmatpush.bf16.msrb.mxu2 %v1297_v24  ;;  %v1368_v40 = vld [vmem:[%s2059_s4 + $0xc] sm:$0xf0]  ;;  %v902_v24 = vld [vmem:[%s2061_s6 + $0x78] sm:$0xff] }
  0x25   :  { %676 = vmatpush.bf16.msrb.mxu3 %v1301_v26 }
  0x26   :  { %483 = vmatpush.bf16.msrb.mxu0 %v1356_v37  ;;  %v1266_v37 = vld [vmem:[%s2059_s4 + $0x30] sm:$0xf0] }
  0x27   :  { %496 = vmatpush.bf16.msrb.mxu1 %v1364_v38  ;;  %v1269_v38 = vor.u32 %v1370_v35, %v1266_v37  ;;  %v916_v35 = vld [vmem:[%s2061_s6 + $0xe8] sm:$0xff] }
  0x28   :  { %664 = vmatpush.bf16.msrb.mxu2 %v1281_v30  ;;  %v901_v30 = vld [vmem:[%s2061_s6 + $0x70] sm:$0xff] }
  0x29   :  { %677 = vmatpush.bf16.msrb.mxu3 %v1285_v32 }
  0x2a   :  { %484 = vmatpush.bf16.msrb.mxu0 %v1355_v41  ;;  %v1366_v41 = vld [vmem:[%s2059_s4 + $0x4] sm:$0xf] }
  0x2b   :  { %497 = vmatpush.bf16.msrb.mxu1 %v1363_v42  ;;  %v1249_v42 = vor.u32 %v1368_v40, %v1248_v39  ;;  %v915_v39 = vld [vmem:[%s2061_s6 + $0xe0] sm:$0xff] }
  0x2c   :  { %665 = vmatpush.bf16.msrb.mxu2 %v1265_v36 }
  0x2d   :  { %678 = vmatpush.bf16.msrb.mxu3 %v1269_v38  ;;  %v899_v38 = vld [vmem:[%s2061_s6 + $0x60] sm:$0xff] }
  0x2e   :  { %485 = vmatpush.bf16.msrb.mxu0 %v1354_v43  ;;  %v1250_v43 = vld [vmem:[%s2059_s4 + $0x10] sm:$0xf0] }
  0x2f   :  { %498 = vmatpush.bf16.msrb.mxu1 %v1362_v44  ;;  %v1253_v44 = vor.u32 %v1366_v41, %v1250_v43  ;;  %v914_v43 = vld [vmem:[%s2061_s6 + $0xd8] sm:$0xff] }
  0x30   :  { %666 = vmatpush.bf16.msrb.mxu2 %v1249_v42  ;;  %v898_v42 = vld [vmem:[%s2061_s6 + $0x58] sm:$0xff] }
  0x31   :  { %679 = vmatpush.bf16.msrb.mxu3 %v1253_v44 }
  0x32   :  { %486 = vmatpush.bf16.msrb.mxu0 %v1353_v45  ;;  %v1304_v45 = vld [vmem:[%s2059_s4 + $0x68] sm:$0xf] }
  0x33   :  { %499 = vmatpush.bf16.msrb.mxu1 %v1361_v46  ;;  %v1381_v46 = vld [vmem:[%s2059_s4 + $0x74] sm:$0xf0] }
  0x36   :  { %487 = vmatpush.bf16.msrb.mxu0 %v1352_v47  ;;  %v1305_v47 = vor.u32 %v1381_v46, %v1304_v45 }
  0x37   :  { %500 = vmatpush.bf16.msrb.mxu1 %v1360_v48  ;;  %v1379_v48 = vld [vmem:[%s2059_s4 + $0x6c] sm:$0xf] }
  0x38   :  { %689 = vmatpush.bf16.msra.mxu2 %v1305_v47 }
  0x3a   :  { %488 = vmatpush.bf16.msrb.mxu0 %v1351_v49  ;;  %v1306_v49 = vld [vmem:[%s2059_s4 + $0x78] sm:$0xf0] }
  0x3b   :  { %501 = vmatpush.bf16.msrb.mxu1 %v1359_v50  ;;  %v1309_v50 = vor.u32 %v1379_v48, %v1306_v49 }
  0x3d   :  { %702 = vmatpush.bf16.msra.mxu3 %v1309_v50  ;;  %v897_v50 = vld [vmem:[%s2061_s6 + $0x50] sm:$0xff] }
  0x3e   :  { %489 = vmatpush.bf16.msrb.mxu0 %v1350_v51  ;;  %v1288_v51 = vld [vmem:[%s2059_s4 + $0x48] sm:$0xf] }
  0x3f   :  { %502 = vmatpush.bf16.msrb.mxu1 %v1358_v52  ;;  %v1377_v52 = vld [vmem:[%s2059_s4 + $0x54] sm:$0xf0] }
  0x41   :  { %490 = vmatmul.bf16.vlgmr.msrb.gmra.mxu0 %v134_v53  ;;  %v1375_v53 = vld [vmem:[%s2059_s4 + $0x4c] sm:$0xf] }
  0x42   :  { %503 = vmatmul.bf16.vlgmr.msrb.gmra.mxu1 %v135_v54  ;;  %955 = vmatpush.msra.mxu0 %v902_v24 }
  0x43   :  { %975 = vmatpush.msra.mxu1 %v918_v25 }
  0x44   :  { %956 = vmatpush.msra.mxu0 %v901_v30 }
  0x45   :  { %976 = vmatpush.msra.mxu1 %v917_v31 }
  0x46   :  { %957 = vmatpush.msra.mxu0 %v900_v34  ;;  %v892_v34 = vld [vmem:[%s2061_s6 + $0x28] sm:$0xff] }
  0x47   :  { %977 = vmatpush.msra.mxu1 %v916_v35  ;;  %v908_v35 = vld [vmem:[%s2061_s6 + $0xa8] sm:$0xff] }
  0x48   :  { %958 = vmatpush.msra.mxu0 %v899_v38 }
  0x49   :  { %978 = vmatpush.msra.mxu1 %v915_v39  ;;  %v948_v39 = vld [vmem:[%s2061_s6 + $0x1e8] sm:$0xff] }
  0x4a   :  { %959 = vmatpush.msra.mxu0 %v898_v42  ;;  %v891_v42 = vld [vmem:[%s2061_s6 + $0x20] sm:$0xff] }
  0x4b   :  { %979 = vmatpush.msra.mxu1 %v914_v43  ;;  %v907_v43 = vld [vmem:[%s2061_s6 + $0xa0] sm:$0xff] }
  0x4c   :  { %960 = vmatpush.msra.mxu0 %v897_v50 }
  0x9e   :  { %v439_v55 = vpop.f32.mrf.mxu0 }
  0x9f   :  { %v452_v56 = vpop.f32.mrf.mxu1 }
  0xa0   :  { %v453_v63 = vadd.f32 %v452_v56, %v439_v55  ;;  %v1289_v55 = vor.u32 %v1377_v52, %v1288_v51  ;;  %v1290_v56 = vld [vmem:[%s2059_s4 + $0x58] sm:$0xf0]  ;;  %v913_v51 = vld [vmem:[%s2061_s6 + $0xd0] sm:$0xff] }
  0xa1   :  { %980 = vmatpush.msra.mxu1 %v913_v51 }
  0xa2   :  { %690 = vmatpush.bf16.msra.mxu2 %v1289_v55 }
  0xa6   :  { %v441_v57 = vpop.f32.mrf.mxu0  ;;  %v465_v59 = vpop.f32.mrf.mxu2 }
  0xa7   :  { %v454_v58 = vpop.f32.mrf.mxu1  ;;  %v478_v60 = vpop.f32.mrf.mxu3  ;;  %v466_v0 = vadd.f32 %v465_v59, %v453_v63  ;;  %v1272_v59 = vld [vmem:[%s2059_s4 + $0x28] sm:$0xf] }
  0xa8   :  { %v1293_v58 = vor.u32 %v1375_v53, %v1290_v56  ;;  %v896_v56 = vld [vmem:[%s2061_s6 + $0x48] sm:$0xff] }
  0xa9   :  { %v479_v1 = vadd.f32 %v478_v60, %v466_v0  ;;  %v1373_v60 = vld [vmem:[%s2059_s4 + $0x34] sm:$0xf0]  ;;  %961 = vmatpush.msra.mxu0 %v896_v56 }
  0xaa   :  { %v1273_v0 = vor.u32 %v1373_v60, %v1272_v59  ;;  %703 = vmatpush.bf16.msra.mxu3 %v1293_v58  ;;  %v906_v56 = vld [vmem:[%s2061_s6 + $0x98] sm:$0xff] }
  0xac   :  { %691 = vmatpush.bf16.msra.mxu2 %v1273_v0 }
  0xae   :  { %v467_v61 = vpop.f32.mrf.mxu2 }
  0xaf   :  { %v480_v62 = vpop.f32.mrf.mxu3  ;;  %v1371_v61 = vld [vmem:[%s2059_s4 + $0x2c] sm:$0xf] }
  0xb0   :  { %v1274_v62 = vld [vmem:[%s2059_s4 + $0x38] sm:$0xf0] }
  0xbe   :  { %v491_v2 = vpop.f32.mrf.mxu0 }
  0xbf   :  { %v504_v3 = vpop.f32.mrf.mxu1  ;;  %v492_v4 = vadd.f32 %v491_v2, %v479_v1  ;;  %v1277_v1 = vor.u32 %v1371_v61, %v1274_v62  ;;  %v1256_v2 = vld [vmem:[%s2059_s4 + $0x8] sm:$0xf]  ;;  %v569_v61 = vperm.slane %v1733_v22, 2  ;;  %v895_v62 = vld [vmem:[%s2061_s6 + $0x40] sm:$0xff] }
  0xc0   :  { %962 = vmatpush.msra.mxu0 %v895_v62  ;;  %v889_v62 = vld [vmem:[%s2061_s6 + $0x10] sm:$0xff] }
  0xc1   :  { %v505_v5 = vadd.f32 %v504_v3, %v492_v4  ;;  %v1369_v3 = vld [vmem:[%s2059_s4 + $0x14] sm:$0xf0]  ;;  %v1367_v4 = vld [vmem:[%s2059_s4 + $0xc] sm:$0xf]  ;;  %704 = vmatpush.bf16.msra.mxu3 %v1277_v1  ;;  %v570_v1 = vperm.slane %v1733_v22, 3 }
  0xc3   :  { %v509_v6 = vsel %vm508_vm0, %v505_v5, 0.0 }
  0xc4   :  { %510 = vadd.xlane.f32.xlu0 %v509_v6  ;;  %v1257_v6 = vor.u32 %v1369_v3, %v1256_v2 }
  0xc6   :  { %v493_v7 = vpop.f32.mrf.mxu0  ;;  %692 = vmatpush.bf16.msra.mxu2 %v1257_v6 }
  0xc7   :  { %v506_v8 = vpop.f32.mrf.mxu1 }
 0x137   :  { %v511_v16 = vpop.xlane.xlu0 %510 }
 0x138   :  { %v519_v17 = vmul.f32 %v518_v15, %v511_v16 }
 0x13a   :  { %v1622_v18 = vsub.f32 %v505_v5, %v519_v17  ;;  %v1258_v5 = vld [vmem:[%s2059_s4 + $0x18] sm:$0xf0]  ;;  %v1385_v17 = vld [vmem:[%s2058_s3] ss:$0 sm:$0xff] }
 0x13b   :  { %v1261_v7 = vor.u32 %v1367_v4, %v1258_v5 }
 0x13c   :  { %v521_v19 = vmul.f32 %v1622_v18, %v1622_v18 }
 0x13d   :  { %705 = vmatpush.bf16.msra.mxu3 %v1261_v7 }
 0x13e   :  { %v522_v20 = vsel %vm508_vm0, %v521_v19, 0.0 }
 0x13f   :  { %523 = vadd.xlane.f32.xlu0 %v522_v20 }
 0x1b2   :  { %v524_v54 = vpop.xlane.xlu0 %523 }
 0x1b3   :  { %v525_v57 = vmul.f32 %v524_v54, %v518_v15 }
 0x1b5   :  { %v526_v63 = vadd.f32 1e-06, %v525_v57  ;;  %v912_v57 = vld [vmem:[%s2061_s6 + $0xc8] sm:$0xff] }
 0x1b6   :  { %981 = vmatpush.msra.mxu1 %v912_v57  ;;  %v930_v57 = vld [vmem:[%s2061_s6 + $0x158] sm:$0xff] }
 0x1b7   :  { %1389 = vrsqrt.f32 %v526_v63  ;;  %vm533_vm3 = vweird.f32 %v526_v63 }
 0x1bd   :  { %v1390_v8 = vpop.eup %1389 }
 0x1be   :  { %v528_v9 = vmul.f32 %v1390_v8, %v526_v63  ;;  %vm534_vm2 = vweird.f32 %v1390_v8  ;;  %v911_v63 = vld [vmem:[%s2061_s6 + $0xc0] sm:$0xff] }
 0x1bf   :  { %vm535_vm4 = vmor %vm533_vm3, %vm534_vm2  ;;  %982 = vmatpush.msra.mxu1 %v911_v63  ;;  %v905_v63 = vld [vmem:[%s2061_s6 + $0x90] sm:$0xff] }
 0x1c0   :  { %v529_v10 = vmul.f32 %v1390_v8, %v528_v9  ;;  %v910_v9 = vld [vmem:[%s2061_s6 + $0xb8] sm:$0xff] }
 0x1c1   :  { %983 = vmatpush.msra.mxu1 %v910_v9  ;;  %v904_v9 = vld [vmem:[%s2061_s6 + $0x88] sm:$0xff] }
 0x1c2   :  { %v530_v11 = vmul.f32 0.5, %v529_v10  ;;  %v934_v10 = vld [vmem:[%s2061_s6 + $0x178] sm:$0xff] }
 0x1c4   :  { %v531_v12 = vsub.f32 1.5, %v530_v11 }
 0x1c6   :  { %v532_v13 = vmul.f32 %v1390_v8, %v531_v12 }
 0x1c8   :  { %v536_v15 = vsel %vm535_vm4, %v1390_v8, %v532_v13  ;;  %v894_v8 = vld [vmem:[%s2061_s6 + $0x38] sm:$0xff] }
 0x1c9   :  { %v537_v16 = vmul.f32 %v536_v15, %v1622_v18  ;;  %v568_v18 = vperm.slane %v1733_v22, 1  ;;  %963 = vmatpush.msra.mxu0 %v894_v8  ;;  %v950_v15 = vld [vmem:[%s2061_s6 + $0x1f8] sm:$0xff]  ;;  %v949_v22 = vld [vmem:[%s2061_s6 + $0x1f0] sm:$0xff]  ;;  %v888_v8 = vld [vmem:[%s2061_s6 + $0x8] sm:$0xff] }
 0x1cb   :  { %v542_v19 = vmul.f32 %v1384_v14, %v537_v16  ;;  %v893_v16 = vld [vmem:[%s2061_s6 + $0x30] sm:$0xff] }
 0x1cc   :  { %964 = vmatpush.msra.mxu0 %v893_v16 }
 0x1cd   :  { %v547_v20 = vadd.f32 %v1385_v17, %v542_v19  ;;  %v909_v17 = vld [vmem:[%s2061_s6 + $0xb0] sm:$0xff] }
 0x1ce   :  { %984 = vmatpush.msra.mxu1 %v909_v17  ;;  %965 = vmatpush.msra.mxu0 %v892_v34 }
 0x1cf   :  { %v548_v21 = vpack.c.bf16 %v547_v20, %v547_v20 }
 0x1d0   :  { %985 = vmatpush.msra.mxu1 %v908_v35  ;;  %966 = vmatpush.msra.mxu0 %v891_v42 }
 0x1d1   :  { %1310 = vmatmul.msk.bf16.vlgmr.msrb.gmra.mxu2 %vm655_vm5, %v548_v21  ;;  %1311 = vmatmul.msk.bf16.vlgmr.msrb.gmra.mxu3 %vm655_vm5, %v548_v21 }
 0x1d2   :  { %995 = vmatpush.msrb.mxu2 %v934_v10  ;;  %1015 = vmatpush.msrb.mxu3 %v950_v15  ;;  %v928_v10 = vld [vmem:[%s2061_s6 + $0x148] sm:$0xff] }
 0x1d3   :  { %986 = vmatpush.msra.mxu1 %v907_v43 }
 0x1d4   :  { %1016 = vmatpush.msrb.mxu3 %v949_v22 }
 0x1d5   :  { %987 = vmatpush.msra.mxu1 %v906_v56  ;;  %v939_v56 = vld [vmem:[%s2061_s6 + $0x1a0] sm:$0xff] }
 0x1d6   :  { %1017 = vmatpush.msrb.mxu3 %v948_v39 }
 0x1d7   :  { %988 = vmatpush.msra.mxu1 %v905_v63 }
 0x1d9   :  { %989 = vmatpush.msra.mxu1 %v904_v9  ;;  %v921_v9 = vld [vmem:[%s2061_s6 + $0x110] sm:$0xff] }
 0x1e1   :  { %1312 = vmatmul.msk.bf16.vlgmr.msra.gmra.mxu2 %vm655_vm5, %v548_v21  ;;  %1313 = vmatmul.msk.bf16.vlgmr.msra.gmra.mxu3 %vm655_vm5, %v548_v21  ;;  %v933_v21 = vld [vmem:[%s2061_s6 + $0x170] sm:$0xff] }
 0x1e2   :  { %996 = vmatpush.msrb.mxu2 %v933_v21  ;;  %v943_v21 = vld [vmem:[%s2061_s6 + $0x1c0] sm:$0xff] }
 0x254   :  { %v668_v26 = vpop.f32.mrf.mxu2  ;;  %v681_v27 = vpop.f32.mrf.mxu3 }
 0x255   :  { %v1743_v28 = vadd.f32 %v668_v26, %v567_v23  ;;  %v1745_v29 = vadd.f32 %v681_v27, %v568_v18 }
 0x257   :  { %v1754_v32 = vmul.f32 0.70710677, %v1743_v28  ;;  %v1757_v33 = vmul.f32 0.70710677, %v1745_v29 }
 0x259   :  { %v719_v36 = vmul.f32 %v1754_v32, %v1754_v32  ;;  %v759_v37 = vmul.f32 %v1757_v33, %v1757_v33 }
 0x25b   :  { %v1775_v40 = vmin.f32 %v719_v36, 16.0  ;;  %v1777_v41 = vmin.f32 %v759_v37, 16.0  ;;  %v932_v36 = vld [vmem:[%s2061_s6 + $0x168] sm:$0xff] }
 0x25c   :  { %v670_v44 = vpop.f32.mrf.mxu2  ;;  %v683_v45 = vpop.f32.mrf.mxu3  ;;  %997 = vmatpush.msrb.mxu2 %v932_v36 }
 0x25d   :  { %v721_v46 = vmul.f32 2.1237322e-06, %v1775_v40  ;;  %v732_v47 = vmul.f32 3.8918573e-05, %v1775_v40  ;;  %v761_v48 = vmul.f32 2.1237322e-06, %v1777_v41 }
 0x25e   :  { %v772_v49 = vmul.f32 3.8918573e-05, %v1777_v41 }
 0x25f   :  { %v722_v52 = vadd.f32 0.00028619796, %v721_v46  ;;  %v733_v53 = vadd.f32 0.001143296, %v732_v47  ;;  %v762_v54 = vadd.f32 0.00028619796, %v761_v48 }
 0x260   :  { %v773_v55 = vadd.f32 0.001143296, %v772_v49 }
 0x261   :  { %v723_v58 = vmul.f32 %v722_v52, %v1775_v40  ;;  %v734_v59 = vmul.f32 %v733_v53, %v1775_v40  ;;  %v763_v60 = vmul.f32 %v762_v54, %v1777_v41  ;;  %v931_v52 = vld [vmem:[%s2061_s6 + $0x160] sm:$0xff]  ;;  %v890_v54 = vld [vmem:[%s2061_s6 + $0x18] sm:$0xff] }
 0x262   :  { %v774_v0 = vmul.f32 %v773_v55, %v1777_v41  ;;  %v947_v53 = vld [vmem:[%s2061_s6 + $0x1e0] sm:$0xff]  ;;  %998 = vmatpush.msrb.mxu2 %v931_v52  ;;  %967 = vmatpush.msra.mxu0 %v890_v54 }
 0x263   :  { %v724_v2 = vadd.f32 0.0036580483, %v723_v58  ;;  %v735_v3 = vadd.f32 0.014752088, %v734_v59  ;;  %v764_v4 = vadd.f32 0.0036580483, %v763_v60  ;;  %1018 = vmatpush.msrb.mxu3 %v947_v53 }
 0x264   :  { %v775_v5 = vadd.f32 0.014752088, %v774_v0  ;;  %v694_v6 = vpop.f32.mrf.mxu2  ;;  %v707_v7 = vpop.f32.mrf.mxu3  ;;  %v946_v58 = vld [vmem:[%s2061_s6 + $0x1d8] sm:$0xff]  ;;  %999 = vmatpush.msrb.mxu2 %v930_v57  ;;  %968 = vmatpush.msra.mxu0 %v889_v62 }
 0x265   :  { %v725_v11 = vmul.f32 %v724_v2, %v1775_v40  ;;  %v736_v12 = vmul.f32 %v735_v3, %v1775_v40  ;;  %v765_v13 = vmul.f32 %v764_v4, %v1777_v41  ;;  %v1825_v14 = vadd.f32 %v694_v6, %v569_v61  ;;  %1019 = vmatpush.msrb.mxu3 %v946_v58  ;;  %v929_v4 = vld [vmem:[%s2061_s6 + $0x150] sm:$0xff] }
 0x266   :  { %v776_v19 = vmul.f32 %v775_v5, %v1777_v41  ;;  %v1837_v20 = vadd.f32 %v707_v7, %v570_v1  ;;  %1000 = vmatpush.msrb.mxu2 %v929_v4  ;;  %969 = vmatpush.msra.mxu0 %v888_v8 }
 0x267   :  { %v726_v23 = vadd.f32 0.05243302, %v725_v11  ;;  %v737_v18 = vadd.f32 0.112945676, %v736_v12  ;;  %v766_v24 = vadd.f32 0.05243302, %v765_v13 }
 0x268   :  { %v777_v25 = vadd.f32 0.112945676, %v776_v19  ;;  %v1846_v26 = vmul.f32 0.70710677, %v1825_v14  ;;  %v1851_v31 = vmul.f32 0.70710677, %v1837_v20  ;;  %1001 = vmatpush.msrb.mxu2 %v928_v10 }
 0x269   :  { %v727_v27 = vmul.f32 %v726_v23, %v1775_v40  ;;  %v738_v30 = vmul.f32 %v737_v18, %v1775_v40  ;;  %v767_v46 = vmul.f32 %v766_v24, %v1777_v41  ;;  %v944_v11 = vld [vmem:[%s2061_s6 + $0x1c8] sm:$0xff]  ;;  %v887_v12 = vld [vmem:[%s2061_s6] sm:$0xff]  ;;  %v937_v10 = vld [vmem:[%s2061_s6 + $0x190] sm:$0xff] }
 0x26a   :  { %v778_v37 = vmul.f32 %v777_v25, %v1777_v41  ;;  %v799_v38 = vmul.f32 %v1846_v26, %v1846_v26  ;;  %v839_v47 = vmul.f32 %v1851_v31, %v1851_v31  ;;  %v903_v13 = vld [vmem:[%s2061_s6 + $0x80] sm:$0xff]  ;;  %970 = vmatpush.msra.mxu0 %v887_v12  ;;  %v942_v25 = vld [vmem:[%s2061_s6 + $0x1b8] sm:$0xff] }
 0x26b   :  { %v728_v44 = vadd.f32 0.18741608, %v727_v27  ;;  %v739_v45 = vadd.f32 0.4994258, %v738_v30  ;;  %v768_v2 = vadd.f32 0.18741608, %v767_v46  ;;  %990 = vmatpush.msra.mxu1 %v903_v13 }
 0x26c   :  { %v779_v48 = vadd.f32 0.4994258, %v778_v37  ;;  %v1877_v49 = vmin.f32 %v799_v38, 16.0  ;;  %v696_v50 = vpop.f32.mrf.mxu2  ;;  %v709_v51 = vpop.f32.mrf.mxu3  ;;  %v1910_v3 = vmin.f32 %v839_v47, 16.0  ;;  %v927_v19 = vld [vmem:[%s2061_s6 + $0x140] sm:$0xff]  ;;  %v925_v27 = vld [vmem:[%s2061_s6 + $0x130] sm:$0xff] }
 0x26d   :  { %v740_v55 = vmul.f32 %v739_v45, %v1775_v40  ;;  %v729_v0 = vmul.f32 %v728_v44, %v1775_v40  ;;  %v945_v40 = vld [vmem:[%s2061_s6 + $0x1d0] sm:$0xff]  ;;  %v769_v16 = vmul.f32 %v768_v2, %v1777_v41  ;;  %1002 = vmatpush.msrb.mxu2 %v927_v19  ;;  %v924_v46 = vld [vmem:[%s2061_s6 + $0x128] sm:$0xff] }
 0x26e   :  { %v780_v59 = vmul.f32 %v779_v48, %v1777_v41  ;;  %v801_v60 = vmul.f32 2.1237322e-06, %v1877_v49  ;;  %v812_v61 = vmul.f32 3.8918573e-05, %v1877_v49  ;;  %1020 = vmatpush.msrb.mxu3 %v945_v40  ;;  %v841_v23 = vmul.f32 2.1237322e-06, %v1910_v3 }
 0x26f   :  { %v1908_v1 = vadd.f32 1.0, %v740_v55  ;;  %v730_v15 = vadd.f32 1.1283791, %v729_v0  ;;  %v852_v18 = vmul.f32 3.8918573e-05, %v1910_v3  ;;  %v926_v41 = vld [vmem:[%s2061_s6 + $0x138] sm:$0xff] }
 0x270   :  { %v1915_v5 = vadd.f32 1.0, %v780_v59  ;;  %v802_v6 = vadd.f32 0.00028619796, %v801_v60  ;;  %v813_v7 = vadd.f32 0.001143296, %v812_v61  ;;  %1021 = vmatpush.msrb.mxu3 %v944_v11  ;;  %1003 = vmatpush.msrb.mxu2 %v926_v41  ;;  %v941_v38 = vld [vmem:[%s2061_s6 + $0x1b0] sm:$0xff] }
 0x271   :  { %1391 = vrcp.f32 %v1908_v1  ;;  %v842_v34 = vadd.f32 0.00028619796, %v841_v23  ;;  %v853_v35 = vadd.f32 0.001143296, %v852_v18  ;;  %v770_v37 = vadd.f32 1.1283791, %v769_v16 }
 0x272   :  { %1393 = vrcp.f32 %v1915_v5  ;;  %v803_v17 = vmul.f32 %v802_v6, %v1877_v49  ;;  %v814_v22 = vmul.f32 %v813_v7, %v1877_v49  ;;  %1022 = vmatpush.msrb.mxu3 %v943_v21  ;;  %v731_v42 = vmul.f32 %v730_v15, %v1754_v32  ;;  %v940_v47 = vld [vmem:[%s2061_s6 + $0x1a8] sm:$0xff]  ;;  %1004 = vmatpush.msrb.mxu2 %v925_v27  ;;  %v923_v55 = vld [vmem:[%s2061_s6 + $0x120] sm:$0xff]  ;;  %v922_v0 = vld [vmem:[%s2061_s6 + $0x118] sm:$0xff] }
 0x273   :  { %v843_v45 = vmul.f32 %v842_v34, %v1910_v3  ;;  %vm747_vm6 = vweird.f32 %v1908_v1  ;;  %v751_v48 = vand.u32 2147483647, %v1908_v1  ;;  %v854_v50 = vmul.f32 %v853_v35, %v1910_v3  ;;  %v936_v19 = vld [vmem:[%s2061_s6 + $0x188] sm:$0xff]  ;;  %v919_v27 = vld [vmem:[%s2061_s6 + $0x100] sm:$0xff] }
 0x274   :  { %v804_v24 = vadd.f32 0.0036580483, %v803_v17  ;;  %v815_v30 = vadd.f32 0.014752088, %v814_v22  ;;  %1023 = vmatpush.msrb.mxu3 %v942_v25  ;;  %v753_v52 = vand.u32 2147483648, %v1908_v1  ;;  %v771_v57 = vmul.f32 %v770_v37, %v1757_v33  ;;  %1005 = vmatpush.msrb.mxu2 %v924_v46  ;;  %v938_v33 = vld [vmem:[%s2061_s6 + $0x198] sm:$0xff] }
 0x275   :  { %v844_v59 = vadd.f32 0.0036580483, %v843_v45  ;;  %v855_v60 = vadd.f32 0.014752088, %v854_v50  ;;  %v793_v62 = vand.u32 2147483648, %v1915_v5  ;;  %vm787_vm9 = vweird.f32 %v1915_v5 }
 0x276   :  { %v816_v44 = vmul.f32 %v815_v30, %v1877_v49  ;;  %1024 = vmatpush.msrb.mxu3 %v941_v38  ;;  %v805_v53 = vmul.f32 %v804_v24, %v1877_v49  ;;  %v791_v4 = vand.u32 2147483647, %v1915_v5  ;;  %1006 = vmatpush.msrb.mxu2 %v923_v55  ;;  %v754_v11 = vor.u32 1.1754944e-38, %v753_v52  ;;  %v935_v30 = vld [vmem:[%s2061_s6 + $0x180] sm:$0xff] }
 0x277   :  { %v1960_v36 = vpop.eup %1391  ;;  %v856_v6 = vmul.f32 %v855_v60, %v1910_v3  ;;  %vm752_vm11 = vcmp.eq.f32.partialorder %v751_v48, 8.507059e+37  ;;  %v794_v16 = vor.u32 1.1754944e-38, %v793_v62  ;;  %v712_v45 = vmul.f32 0.5, %v1745_v29 }
 0x278   :  { %v1965_v39 = vpop.eup %1393  ;;  %v743_v43 = vmul.f32 %v1960_v36, %v1908_v1  ;;  %v817_v54 = vadd.f32 0.112945676, %v816_v44  ;;  %1025 = vmatpush.msrb.mxu3 %v940_v47  ;;  %vm748_vm7 = vweird.f32 %v1960_v36  ;;  %v806_v40 = vadd.f32 0.05243302, %v805_v53  ;;  %1007 = vmatpush.msrb.mxu2 %v922_v0  ;;  %v920_v1 = vld [vmem:[%s2061_s6 + $0x108] sm:$0xff] }
 0x279   :  { %v783_v32 = vmul.f32 %v1965_v39, %v1915_v5  ;;  %vm788_vm8 = vweird.f32 %v1965_v39  ;;  %vm749_vm10 = vmor %vm747_vm6, %vm748_vm7  ;;  %v845_v5 = vmul.f32 %v844_v59, %v1910_v3  ;;  %v857_v13 = vadd.f32 0.112945676, %v856_v6 }
 0x27a   :  { %v744_v51 = vsub.f32 1.0, %v743_v43  ;;  %v818_v63 = vmul.f32 %v817_v54, %v1877_v49  ;;  %1026 = vmatpush.msrb.mxu3 %v939_v56  ;;  %vm789_vm12 = vmor %vm787_vm9, %vm788_vm8  ;;  %vm792_vm13 = vcmp.eq.f32.partialorder %v791_v4, 8.507059e+37  ;;  %1008 = vmatpush.msrb.mxu2 %v921_v9  ;;  %v807_v24 = vmul.f32 %v806_v40, %v1877_v49 }
 0x27b   :  { %v784_v58 = vsub.f32 1.0, %v783_v32  ;;  %v858_v23 = vmul.f32 %v857_v13, %v1910_v3  ;;  %v846_v35 = vadd.f32 0.05243302, %v845_v5  ;;  %vm1036_vm6 = vcmask 9216  }
 0x27c   :  { %v745_v61 = vmul.f32 %v1960_v36, %v744_v51  ;;  %v819_v8 = vadd.f32 0.4994258, %v818_v63  ;;  %1027 = vmatpush.msrb.mxu3 %v938_v33  ;;  %1009 = vmatpush.msrb.mxu2 %v920_v1  ;;  %v808_v44 = vadd.f32 0.18741608, %v807_v24 }
 0x27d   :  { %v785_v2 = vmul.f32 %v1965_v39, %v784_v58  ;;  %v847_v47 = vmul.f32 %v846_v35, %v1910_v3 }
 0x27e   :  { %v746_v7 = vadd.f32 %v1960_v36, %v745_v61  ;;  %v820_v17 = vmul.f32 %v819_v8, %v1877_v49  ;;  %1028 = vmatpush.msrb.mxu3 %v937_v10  ;;  %1010 = vmatpush.msrb.mxu2 %v919_v27  ;;  %v809_v52 = vmul.f32 %v808_v44, %v1877_v49 }
 0x27f   :  { %v786_v12 = vadd.f32 %v1965_v39, %v785_v2  ;;  %v848_v54 = vadd.f32 0.18741608, %v847_v47 }
 0x280   :  { %v750_v15 = vsel %vm749_vm10, %v1960_v36, %v746_v7  ;;  %v821_v25 = vadd.f32 1.0, %v820_v17  ;;  %v859_v36 = vadd.f32 0.4994258, %v858_v23  ;;  %1029 = vmatpush.msrb.mxu3 %v936_v19  ;;  %v714_v17 = vmul.f32 0.5, %v1837_v20 }
 0x281   :  { %v755_v21 = vsel %vm752_vm11, %v754_v11, %v750_v15  ;;  %v790_v22 = vsel %vm789_vm12, %v1965_v39, %v786_v12  ;;  %v849_v59 = vmul.f32 %v848_v54, %v1910_v3  ;;  %v713_v11 = vmul.f32 0.5, %v1825_v14 }
 0x282   :  { %v756_v18 = vmul.f32 %v755_v21, %v731_v42  ;;  %v795_v41 = vsel %vm792_vm13, %v794_v16, %v790_v22  ;;  %1395 = vrcp.f32 %v821_v25  ;;  %v860_v39 = vmul.f32 %v859_v36, %v1910_v3  ;;  %1030 = vmatpush.msrb.mxu3 %v935_v30  ;;  %v1386_v21 = vld [vmem:[%s2062_s7] ss:$0 sm:$0xff] }
 0x283   :  { %v796_v34 = vmul.f32 %v795_v41, %v771_v57  ;;  %v711_v42 = vmul.f32 0.5, %v1743_v28  ;;  %v810_v28 = vadd.f32 1.1283791, %v809_v52  ;;  %v833_v56 = vand.u32 2147483648, %v821_v25 }
 0x284   :  { %v1314_v37 = vclamps-f32 %v756_v18, 1.0  ;;  %v861_v48 = vadd.f32 1.0, %v860_v39  ;;  %v831_v29 = vand.u32 2147483647, %v821_v25  ;;  %vm827_vm15 = vweird.f32 %v821_v25 }
 0x285   :  { %v1315_v38 = vclamps-f32 %v796_v34, 1.0  ;;  %v811_v62 = vmul.f32 %v810_v28, %v1846_v26  ;;  %v834_v49 = vor.u32 1.1754944e-38, %v833_v56  ;;  %v850_v33 = vadd.f32 1.1283791, %v849_v59 }
 0x286   :  { %v879_v43 = vadd.f32 1.0, %v1314_v37  ;;  %1397 = vrcp.f32 %v861_v48  ;;  %vm832_vm1 = vcmp.eq.f32.partialorder %v831_v29, 8.507059e+37  ;;  %v873_v2 = vand.u32 2147483648, %v861_v48 }
 0x287   :  { %v880_v46 = vadd.f32 1.0, %v1315_v38  ;;  %v871_v7 = vand.u32 2147483647, %v861_v48  ;;  %vm867_vm3 = vweird.f32 %v861_v48  ;;  %v851_v10 = vmul.f32 %v850_v33, %v1851_v31 }
 0x288   :  { %v883_v32 = vmul.f32 %v879_v43, %v711_v42  ;;  %v1396_v51 = vpop.eup %1395  ;;  %v874_v9 = vor.u32 1.1754944e-38, %v873_v2 }
 0x289   :  { %v884_v50 = vmul.f32 %v880_v46, %v712_v45  ;;  %v823_v53 = vmul.f32 %v1396_v51, %v821_v25  ;;  %vm828_vm14 = vweird.f32 %v1396_v51  ;;  %vm872_vm5 = vcmp.eq.f32.partialorder %v871_v7, 8.507059e+37 }
 0x28a   :  { %971 = vmatmul.f32.vlgmr.msra.gmra.mxu0 %v883_v32  ;;  %vm829_vm0 = vmor %vm827_vm15, %vm828_vm14 }
 0x28b   :  { %991 = vmatmul.f32.vlgmr.msra.gmra.mxu1 %v884_v50  ;;  %v824_v55 = vsub.f32 1.0, %v823_v53 }
 0x28c   :  { %v1398_v57 = vpop.eup %1397 }
 0x28d   :  { %v825_v58 = vmul.f32 %v1396_v51, %v824_v55  ;;  %v863_v60 = vmul.f32 %v1398_v57, %v861_v48  ;;  %vm868_vm2 = vweird.f32 %v1398_v57 }
 0x28e   :  { %vm869_vm4 = vmor %vm867_vm3, %vm868_vm2 }
 0x28f   :  { %v826_v61 = vadd.f32 %v1396_v51, %v825_v58  ;;  %v864_v63 = vsub.f32 1.0, %v863_v60 }
 0x291   :  { %v830_v0 = vsel %vm829_vm0, %v1396_v51, %v826_v61  ;;  %v865_v6 = vmul.f32 %v1398_v57, %v864_v63 }
 0x292   :  { %v835_v4 = vsel %vm832_vm1, %v834_v49, %v830_v0 }
 0x293   :  { %v836_v40 = vmul.f32 %v835_v4, %v811_v62  ;;  %v866_v8 = vadd.f32 %v1398_v57, %v865_v6 }
 0x295   :  { %v1316_v3 = vclamps-f32 %v836_v40, 1.0  ;;  %v870_v26 = vsel %vm869_vm4, %v1398_v57, %v866_v8 }
 0x296   :  { %v875_v5 = vsel %vm872_vm5, %v874_v9, %v870_v26 }
 0x297   :  { %v881_v12 = vadd.f32 1.0, %v1316_v3  ;;  %v876_v13 = vmul.f32 %v875_v5, %v851_v10 }
 0x299   :  { %v885_v15 = vmul.f32 %v881_v12, %v713_v11  ;;  %v1317_v16 = vclamps-f32 %v876_v13, 1.0 }
 0x29b   :  { %1011 = vmatmul.f32.vlgmr.msrb.gmra.mxu2 %v885_v15  ;;  %v882_v1 = vadd.f32 1.0, %v1317_v16 }
 0x29d   :  { %v886_v19 = vmul.f32 %v882_v1, %v714_v17 }
 0x29f   :  { %1031 = vmatmul.f32.vlgmr.msrb.gmra.mxu3 %v886_v19 }
 0x307   :  { %v972_v31 = vpop.f32.mrf.mxu0 }
 0x308   :  { %v973_v22 = vadd.f32 %v1386_v21, %v972_v31  ;;  %v992_v23 = vpop.f32.mrf.mxu1 }
 0x30a   :  { %v993_v18 = vadd.f32 %v992_v23, %v973_v22 }
 0x31e   :  { %v1012_v14 = vpop.f32.mrf.mxu2 }
 0x31f   :  { %v1013_v41 = vadd.f32 %v1012_v14, %v993_v18 }
 0x322   :  { %v1032_v24 = vpop.f32.mrf.mxu3 }
 0x323   :  { %v1033_v25 = vadd.f32 %v1032_v24, %v1013_v41 }
 0x325   :  { %1399 = vtanh.f32 %v1033_v25 }
 0x32b   :  { %v1400_v20 = vpop.eup %1399 }
 0x32c   :  { %1037 = vst.msk [vmem:[#allocation2] sm:$0x3] %vm1036_vm6, %v1400_v20 }
 0x32d   :  { %1048 = dma.vmem_to_hbm [thread:$0]  %s1044_s22, 32, %s1046_s25, [#allocation3]  }
 0x32e   :  { %1425 = dma.done.wait [#allocation3], 32  }
 0x32f   :  { %1426 = vsyncadd [#allocation3], 4294967264 }
 0x330   :  { %1053 = vsyncpa [#allocation3], 1 }

</bundles_post_ra>
